<compile_context>
chip_gen: v5e
topology: v5e:2x2
jax: 0.10.0
libtpu: 0.0.40
codegen_flags: <defaults>
</compile_context>

<pallas_src>
import jax
import jax.numpy as jnp
from jax.experimental import pallas as pl
from jax.experimental.pallas import tpu as pltpu

_LANE = 128
_SUBLANE = 8
_NEG_INF = -1e30  # bias for padded action lanes; exp(-1e30 - m) == 0


def _round_up(x, m):
    return ((x + m - 1) // m) * m


def _policy_kernel(x_ref, w1_ref, b1_ref, w2_ref, b2_ref, o_ref):
    # x_ref : (TB, F)      w1_ref: (F, Hp)   b1_ref: (1, Hp)
    # w2_ref: (Hp, Ap)     b2_ref: (1, Ap)   o_ref : (TB, Ap)
    x = x_ref[...].astype(w1_ref.dtype)

    # linear1 + ReLU (MXU matmul in weight dtype, f32 accumulation)
    h = jnp.dot(x, w1_ref[...], preferred_element_type=jnp.float32) + b1_ref[...]
    h = jnp.maximum(h, 0.0)

    # linear2
    y = jnp.dot(h.astype(w2_ref.dtype), w2_ref[...],
                preferred_element_type=jnp.float32) + b2_ref[...]

    # LogSoftmax over the (padded, lane-dense) action axis.  Padded lanes carry
    # a -1e30 bias so they do not contribute to max / logsumexp.
    m = jnp.max(y, axis=-1, keepdims=True)
    z = y - m
    lse = jnp.log(jnp.sum(jnp.exp(z), axis=-1, keepdims=True))
    o_ref[...] = z - lse


def prepare_policy_params(w1, b1, w2, b2, *, compute_dtype=jnp.float32):
    """Cast / pad PolicyNetwork parameters ONCE, outside the per-call hot path.

    w1: (in_features, hidden)   (transposed vs. PyTorch nn.Linear.weight)
    b1: (hidden,)
    w2: (hidden, num_actions)
    b2: (num_actions,)
    compute_dtype: dtype of the MXU operands (f32 or bf16); accumulation and
                   bias/softmax math stays f32.
    """
    in_features, hidden = w1.shape
    num_actions = w2.shape[1]
    hp = _round_up(hidden, _LANE)
    ap = _round_up(num_actions, _LANE)

    w1p = jnp.zeros((in_features, hp), jnp.float32).at[:, :hidden].set(
        w1.astype(jnp.float32))
    b1p = jnp.zeros((1, hp), jnp.float32).at[0, :hidden].set(
        b1.astype(jnp.float32))
    w2p = jnp.zeros((hp, ap), jnp.float32).at[:hidden, :num_actions].set(
        w2.astype(jnp.float32))
    b2p = jnp.full((1, ap), _NEG_INF, jnp.float32).at[0, :num_actions].set(
        b2.astype(jnp.float32))

    return {
        "w1": w1p.astype(compute_dtype),
        "b1": b1p,                     # biases stay f32 (added post-accumulation)
        "w2": w2p.astype(compute_dtype),
        "b2": b2p,
        "num_actions": num_actions,
        "in_features": in_features,
    }


def policy_network_forward_batched(states, params, *, tile_batch=128):
    """Forward pass for a batch of states.

    states : (B, ...) — each row is flattened to (in_features,)
    returns: (B, num_actions) log-probabilities
    """
    num_actions = params["num_actions"]
    in_features = params["in_features"]
    w1p, b1p, w2p, b2p = params["w1"], params["b1"], params["w2"], params["b2"]
    hp = w1p.shape[1]
    ap = w2p.shape[1]

    batch = states.shape[0]
    x = states.reshape(batch, in_features).astype(jnp.float32)

    # Batch tile: 128 rows for real batches, rounded to a sublane multiple for
    # tiny ones.  Pad the batch so the grid divides evenly.
    if batch <= tile_batch:
        tb = max(_round_up(batch, _SUBLANE), _SUBLANE)
    else:
        tb = tile_batch
    b_pad = _round_up(batch, tb)
    if b_pad != batch:
        x = jnp.pad(x, ((0, b_pad - batch), (0, 0)))

    out = pl.pallas_call(
        _policy_kernel,
        out_shape=jax.ShapeDtypeStruct((b_pad, ap), jnp.float32),
        grid=(b_pad // tb,),
        in_specs=[
            pl.BlockSpec((tb, in_features), lambda i: (i, 0)),   # state tile
            pl.BlockSpec((in_features, hp), lambda i: (0, 0)),   # w1 resident
            pl.BlockSpec((1, hp), lambda i: (0, 0)),             # b1 resident
            pl.BlockSpec((hp, ap), lambda i: (0, 0)),            # w2 resident
            pl.BlockSpec((1, ap), lambda i: (0, 0)),             # b2 resident
        ],
        out_specs=pl.BlockSpec((tb, ap), lambda i: (i, 0)),
        compiler_params=pltpu.CompilerParams(
            dimension_semantics=("parallel",)),
    )(x, w1p, b1p, w2p, b2p)

    return out[:batch, :num_actions]


def policy_network_forward(state, params):
    """Exact equivalent of PolicyNetwork.forward on a single state."""
    return policy_network_forward_batched(state.reshape(1, -1), params)[0]


def _reference_forward_batched(states, w1, b1, w2, b2):
    x = states.reshape(states.shape[0], -1).astype(jnp.float32)
    h = jnp.maximum(x @ w1 + b1, 0.0)
    y = h @ w2 + b2
    return jax.nn.log_softmax(y, axis=-1)


if __name__ == "__main__":
    # Small shapes consistent with the module: the "state" is an area/point
    # observation that gets flattened -> in_features.
    in_features = 64          # e.g. an 8x8 area observation
    hidden_size = 32
    num_actions = 8

    key = jax.random.PRNGKey(0)
    k_state, k_w1, k_b1, k_w2, k_b2, k_big = jax.random.split(key, 6)

    lim1 = in_features ** -0.5
    lim2 = hidden_size ** -0.5
    w1 = jax.random.uniform(k_w1, (in_features, hidden_size), jnp.float32, -lim1, lim1)
    b1 = jax.random.uniform(k_b1, (hidden_size,), jnp.float32, -lim1, lim1)
    w2 = jax.random.uniform(k_w2, (hidden_size, num_actions), jnp.float32, -lim2, lim2)
    b2 = jax.random.uniform(k_b2, (num_actions,), jnp.float32, -lim2, lim2)

    # Parameters padded/cast once, outside the RL inner loop.
    params_f32 = prepare_policy_params(w1, b1, w2, b2)

    # --- single state: matches the PyTorch module's forward exactly ---------
    state = jax.random.normal(k_state, (8, 8), dtype=jnp.float32)   # flattens to 64
    out1 = jax.block_until_ready(policy_network_forward(state, params_f32))
    ref1 = _reference_forward_batched(state.reshape(1, -1), w1, b1, w2, b2)[0]
    assert out1.shape == (num_actions,)
    assert jnp.allclose(out1, ref1, atol=1e-5, rtol=1e-5), (out1, ref1)

    # --- batched states: multi-tile grid (260 rows -> padded to 3x128) ------
    big_batch = 260
    states = jax.random.normal(k_big, (big_batch, 8, 8), dtype=jnp.float32)
    outb = jax.block_until_ready(policy_network_forward_batched(states, params_f32))
    refb = _reference_forward_batched(states, w1, b1, w2, b2)
    assert outb.shape == (big_batch, num_actions)
    assert jnp.allclose(outb, refb, atol=1e-4, rtol=1e-4)

    # --- bf16 MXU operands (v6e/v7x fast path), f32 accumulation -------------
    params_bf16 = prepare_policy_params(w1, b1, w2, b2, compute_dtype=jnp.bfloat16)
    outbf = jax.block_until_ready(policy_network_forward_batched(states, params_bf16))
    assert outbf.shape == (big_batch, num_actions)
    assert jnp.allclose(outbf, refb, atol=5e-2), (outbf[:2], refb[:2])

    print("KERNEL_OK")
</pallas_src>

<mosaic_0001>
module attributes {stable_mosaic.version = 11 : i64} {
  func.func @_policy_kernel(%arg0: i32, %arg1: memref<8x64xf32, #tpu.memory_space<vmem>>, %arg2: memref<64x128xf32, #tpu.memory_space<vmem>>, %arg3: memref<1x128xf32, #tpu.memory_space<vmem>>, %arg4: memref<128x128xf32, #tpu.memory_space<vmem>>, %arg5: memref<1x128xf32, #tpu.memory_space<vmem>>, %arg6: memref<8x128xf32, #tpu.memory_space<vmem>>) attributes {dimension_semantics = [#tpu.dimension_semantics<parallel>], iteration_bounds = array<i64: 1>, scalar_prefetch = 0 : i64, scratch_operands = 0 : i64, tpu.core_type = #tpu.core_type<tc>, window_params = [{transform_indices = @transform_0, window_bounds = array<i64: 8, 64>}, {pipeline_mode = #tpu.pipeline_mode<synchronous>, transform_indices = @transform_1, window_bounds = array<i64: 64, 128>}, {pipeline_mode = #tpu.pipeline_mode<synchronous>, transform_indices = @transform_2, window_bounds = array<i64: 1, 128>}, {pipeline_mode = #tpu.pipeline_mode<synchronous>, transform_indices = @transform_3, window_bounds = array<i64: 128, 128>}, {pipeline_mode = #tpu.pipeline_mode<synchronous>, transform_indices = @transform_4, window_bounds = array<i64: 1, 128>}, {transform_indices = @transform_5, window_bounds = array<i64: 8, 128>}]} {
    %c0 = arith.constant 0 : index
    %c0_0 = arith.constant 0 : index
    %0 = vector.load %arg1[%c0, %c0_0] : memref<8x64xf32, #tpu.memory_space<vmem>>, vector<8x64xf32>
    %c0_1 = arith.constant 0 : index
    %c0_2 = arith.constant 0 : index
    %1 = vector.load %arg2[%c0_1, %c0_2] : memref<64x128xf32, #tpu.memory_space<vmem>>, vector<64x128xf32>
    %cst = arith.constant dense<0.000000e+00> : vector<8x128xf32>
    %2 = tpu.matmul %0, %1, %cst {dimension_numbers = #tpu.dot_dimension_numbers<[1], [0], [0], [1], [0, 0, 1, 1], [], []>} : vector<8x64xf32>, vector<64x128xf32>, vector<8x128xf32> -> vector<8x128xf32>
    %c0_3 = arith.constant 0 : index
    %c0_4 = arith.constant 0 : index
    %3 = vector.load %arg3[%c0_3, %c0_4] : memref<1x128xf32, #tpu.memory_space<vmem>>, vector<1x128xf32>
    %4 = vector.broadcast %3 : vector<1x128xf32> to vector<8x128xf32>
    %5 = arith.addf %2, %4 : vector<8x128xf32>
    %cst_5 = arith.constant 0.000000e+00 : f32
    %6 = vector.broadcast %cst_5 : f32 to vector<8x128xf32>
    %7 = arith.maximumf %5, %6 : vector<8x128xf32>
    %c0_6 = arith.constant 0 : index
    %c0_7 = arith.constant 0 : index
    %8 = vector.load %arg4[%c0_6, %c0_7] : memref<128x128xf32, #tpu.memory_space<vmem>>, vector<128x128xf32>
    %cst_8 = arith.constant dense<0.000000e+00> : vector<8x128xf32>
    %9 = tpu.matmul %7, %8, %cst_8 {dimension_numbers = #tpu.dot_dimension_numbers<[1], [0], [0], [1], [0, 0, 1, 1], [], []>} : vector<8x128xf32>, vector<128x128xf32>, vector<8x128xf32> -> vector<8x128xf32>
    %c0_9 = arith.constant 0 : index
    %c0_10 = arith.constant 0 : index
    %10 = vector.load %arg5[%c0_9, %c0_10] : memref<1x128xf32, #tpu.memory_space<vmem>>, vector<1x128xf32>
    %11 = vector.broadcast %10 : vector<1x128xf32> to vector<8x128xf32>
    %12 = arith.addf %9, %11 : vector<8x128xf32>
    %cst_11 = arith.constant dense<0xFF800000> : vector<8xf32>
    %13 = vector.multi_reduction <maximumf>, %12, %cst_11 [1] : vector<8x128xf32> to vector<8xf32>
    %14 = vector.shape_cast %13 : vector<8xf32> to vector<8x1xf32>
    %15 = vector.broadcast %14 : vector<8x1xf32> to vector<8x128xf32>
    %16 = arith.subf %12, %15 : vector<8x128xf32>
    %17 = math.exp %16 : vector<8x128xf32>
    %cst_12 = arith.constant dense<0.000000e+00> : vector<8xf32>
    %18 = vector.multi_reduction <add>, %17, %cst_12 [1] : vector<8x128xf32> to vector<8xf32>
    %19 = vector.shape_cast %18 : vector<8xf32> to vector<8x1xf32>
    %20 = math.log %19 : vector<8x1xf32>
    %21 = vector.broadcast %20 : vector<8x1xf32> to vector<8x128xf32>
    %22 = arith.subf %16, %21 : vector<8x128xf32>
    %c0_13 = arith.constant 0 : index
    %c0_14 = arith.constant 0 : index
    %23 = vector.load %arg6[%c0_13, %c0_14] : memref<8x128xf32, #tpu.memory_space<vmem>>, vector<8x128xf32>
    tpu.vector_store %arg6[%c0_13, %c0_14], %22 {strides = array<i32>} : memref<8x128xf32, #tpu.memory_space<vmem>>, vector<8x128xf32>,
    return
  }
  func.func @transform_0(%arg0: i32) -> (i32, i32) {
    %c0_i32 = arith.constant 0 : i32
    %c0_i32_0 = arith.constant 0 : i32
    return %arg0, %c0_i32 : i32, i32
  }
  func.func @transform_1(%arg0: i32) -> (i32, i32) {
    %c0_i32 = arith.constant 0 : i32
    %c0_i32_0 = arith.constant 0 : i32
    %c0_i32_1 = arith.constant 0 : i32
    return %c0_i32, %c0_i32_0 : i32, i32
  }
  func.func @transform_2(%arg0: i32) -> (i32, i32) {
    %c0_i32 = arith.constant 0 : i32
    %c0_i32_0 = arith.constant 0 : i32
    %c0_i32_1 = arith.constant 0 : i32
    return %c0_i32, %c0_i32_0 : i32, i32
  }
  func.func @transform_3(%arg0: i32) -> (i32, i32) {
    %c0_i32 = arith.constant 0 : i32
    %c0_i32_0 = arith.constant 0 : i32
    %c0_i32_1 = arith.constant 0 : i32
    return %c0_i32, %c0_i32_0 : i32, i32
  }
  func.func @transform_4(%arg0: i32) -> (i32, i32) {
    %c0_i32 = arith.constant 0 : i32
    %c0_i32_0 = arith.constant 0 : i32
    %c0_i32_1 = arith.constant 0 : i32
    return %c0_i32, %c0_i32_0 : i32, i32
  }
  func.func @transform_5(%arg0: i32) -> (i32, i32) {
    %c0_i32 = arith.constant 0 : i32
    %c0_i32_0 = arith.constant 0 : i32
    return %arg0, %c0_i32 : i32, i32
  }
}

</mosaic_0001>

<bundles_post_ra>
// kernel: tpu_custom_call.1
= control target key start
LH: loop header
LB: loop body
LE: loop exit
PB: predicated region body
PF: predicated region fallthrough
CT: control target
= control target key end

     0   :  { %10 = vsyncpa [#allocation3], 0  ;;  %s342_s0 = inlined_call_operand.hbm [shape: f32[8,64], index: 0, kind: input, shape index: {}]   ;;  %s343_s1 = inlined_call_operand.hbm [shape: f32[64,128], index: 1, kind: input, shape index: {}]   ;;  %s344_s2 = inlined_call_operand.vmem [shape: f32[1,128], index: 2, kind: input, shape index: {}]   ;;  %s345_s3 = inlined_call_operand.hbm [shape: f32[128,128], index: 3, kind: input, shape index: {}]   ;;  %s346_s4 = inlined_call_operand.vmem [shape: f32[1,128], index: 4, kind: input, shape index: {}]   ;;  %s347_s5 = inlined_call_operand.hbm [shape: f32[8,128], index: 5, kind: output, shape index: {}]  }
   0x1   :  { %11 = vsyncpa [#allocation6], 0  ;;  %s28_s20 = sshll.u32 %s343_s1, 4  ;;  %s29_s20 = int_to_ptr.hbm [resolvable:$true] %s28_s20 }
   0x2   :  { %12 = vsyncpa [#allocation4], 0  ;;  %s288_s21 = smov [#allocation5]   ;;  %s18_s25 = sshll.u32 %s342_s0, 4  ;;  %s19_s25 = int_to_ptr.hbm [resolvable:$true] %s18_s25 }
   0x3   :  { %s30_s22 = sshll.u32 %s288_s21, 4  ;;  %s289_s26 = smov 128   ;;  %s31_s22 = int_to_ptr.vmem [resolvable:$true] %s30_s22 }
   0x4   :  { %s290_s27 = smov 8   ;;  %s291_s28 = smov [#allocation2]  }
   0x5   :  { %36 = dma.hbm_to_vmem [thread:$0]  %s29_s20, 1024, %s31_s22, [#allocation6], %s289_s26, %s289_s26, %s290_s27  }
   0x6   :  { %s20_s29 = sshll.u32 %s291_s28, 4  ;;  %s43_s7 = sshll.u32 %s345_s3, 4  ;;  %s21_s29 = int_to_ptr.vmem [resolvable:$true] %s20_s29  ;;  %s44_s7 = int_to_ptr.hbm [resolvable:$true] %s43_s7 }
   0x7   :  { %23 = dma.hbm_to_vmem [thread:$0]  %s19_s25, 128, %s21_s29, [#allocation3]  }
   0x8   :  { %s292_s1 = smov [#allocation7]  }
   0x9   :  { %s45_s8 = sshll.u32 %s292_s1, 4  ;;  %s46_s8 = int_to_ptr.vmem [resolvable:$true] %s45_s8 }
   0xa   :  { %51 = dma.hbm_to_vmem [thread:$0]  %s44_s7, 2048, %s46_s8, [#allocation6], %s289_s26, %s289_s26, %s290_s27  }
   0xb   :  { %282 = dma.done.wait [#allocation3], 128  }
   0xc   :  { %283 = vsyncadd [#allocation3], 4294967168 }
   0xd   :  { %284 = dma.done.wait [#allocation6], 3072  }
   0xe   :  { %285 = vsyncadd [#allocation6], 4294964224  ;;  %v74_v0 = vld [vmem:[#allocation5 + $0x38] sm:$0xff]  ;;  %v73_v1 = vld [vmem:[#allocation5 + $0x30] sm:$0xff]  ;;  %vm79_vm0 = vcmask 523264   ;;  %s162_s14 = sshll.u32 %s347_s5, 4  ;;  %s163_s14 = int_to_ptr.hbm [resolvable:$true] %s162_s14 }
   0xf   :  { %91 = vmatpush.msra.mxu0 %v74_v0  ;;  %v72_v2 = vld [vmem:[#allocation5 + $0x28] sm:$0xff]  ;;  %v119_v3 = vld [vmem:[#allocation7 + $0x78] sm:$0xff]  ;;  %v118_v4 = vld [vmem:[#allocation7 + $0x70] sm:$0xff] }
  0x10   :  { %v71_v5 = vld [vmem:[#allocation5 + $0x20] sm:$0xff]  ;;  %124 = vmatpush.msra.mxu1 %v119_v3  ;;  %v117_v6 = vld [vmem:[#allocation7 + $0x68] sm:$0xff]  ;;  %v70_v7 = vld [vmem:[#allocation5 + $0x18] sm:$0xff] }
  0x11   :  { %92 = vmatpush.msra.mxu0 %v73_v1  ;;  %v116_v8 = vld [vmem:[#allocation7 + $0x60] sm:$0xff]  ;;  %v69_v9 = vld [vmem:[#allocation5 + $0x10] sm:$0xff]  ;;  %v115_v10 = vld [vmem:[#allocation7 + $0x58] sm:$0xff] }
  0x12   :  { %125 = vmatpush.msra.mxu1 %v118_v4  ;;  %v68_v11 = vld [vmem:[#allocation5 + $0x8] sm:$0xff]  ;;  %v114_v12 = vld [vmem:[#allocation7 + $0x50] sm:$0xff]  ;;  %v67_v13 = vld [vmem:[#allocation5] sm:$0xff] }
  0x13   :  { %93 = vmatpush.msra.mxu0 %v72_v2  ;;  %v66_v14 = vld [vmem:[#allocation2] sm:$0xff]  ;;  %v113_v15 = vld [vmem:[#allocation7 + $0x48] sm:$0xff]  ;;  %v112_v16 = vld [vmem:[#allocation7 + $0x40] sm:$0xff] }
  0x14   :  { %126 = vmatpush.msra.mxu1 %v117_v6  ;;  %v111_v17 = vld [vmem:[#allocation7 + $0x38] sm:$0xff]  ;;  %v110_v18 = vld [vmem:[#allocation7 + $0x30] sm:$0xff]  ;;  %v109_v19 = vld [vmem:[#allocation7 + $0x28] sm:$0xff] }
  0x15   :  { %94 = vmatpush.msra.mxu0 %v71_v5  ;;  %v108_v20 = vld [vmem:[#allocation7 + $0x20] sm:$0xff]  ;;  %v107_v21 = vld [vmem:[#allocation7 + $0x18] sm:$0xff]  ;;  %v106_v22 = vld [vmem:[#allocation7 + $0x10] sm:$0xff] }
  0x16   :  { %127 = vmatpush.msra.mxu1 %v116_v8  ;;  %v105_v23 = vld [vmem:[#allocation7 + $0x8] sm:$0xff]  ;;  %v104_v24 = vld [vmem:[#allocation7] sm:$0xff]  ;;  %v180_v25 = vld [vmem:[%s344_s2] ss:$0 sm:$0xff]  ;;  %s293_s2 = smov [#allocation8]  }
  0x17   :  { %95 = vmatpush.msra.mxu0 %v70_v7  ;;  %v181_v29 = vld [vmem:[%s346_s4] ss:$0 sm:$0xff]  ;;  %s160_s11 = sshll.u32 %s293_s2, 4  ;;  %s161_s11 = int_to_ptr.vmem [resolvable:$true] %s160_s11 }
  0x18   :  { %128 = vmatpush.msra.mxu1 %v115_v10 }
  0x19   :  { %96 = vmatpush.msra.mxu0 %v69_v9 }
  0x1a   :  { %129 = vmatpush.msra.mxu1 %v114_v12 }
  0x1b   :  { %97 = vmatpush.msra.mxu0 %v68_v11 }
  0x1c   :  { %130 = vmatpush.msra.mxu1 %v113_v15 }
  0x1d   :  { %98 = vmatpush.msra.mxu0 %v67_v13 }
  0x1e   :  { %173 = vmatmul.msk.f32.vlgmr.msra.gmra.mxu0 %vm79_vm0, %v66_v14  ;;  %131 = vmatpush.msra.mxu1 %v112_v16 }
  0x20   :  { %132 = vmatpush.msra.mxu1 %v111_v17 }
  0x22   :  { %133 = vmatpush.msra.mxu1 %v110_v18 }
  0x24   :  { %134 = vmatpush.msra.mxu1 %v109_v19 }
  0x26   :  { %135 = vmatpush.msra.mxu1 %v108_v20 }
  0x28   :  { %136 = vmatpush.msra.mxu1 %v107_v21 }
  0x2a   :  { %137 = vmatpush.msra.mxu1 %v106_v22 }
  0x2c   :  { %138 = vmatpush.msra.mxu1 %v105_v23 }
  0x2e   :  { %139 = vmatpush.msra.mxu1 %v104_v24 }
  0x9b   :  { %v100_v26 = vpop.f32.mrf.mxu0 }
  0x9c   :  { %v101_v27 = vadd.f32 %v180_v25, %v100_v26 }
  0x9e   :  { %v103_v28 = vmax.f32 %v101_v27, 0.0 }
  0xa0   :  { %140 = vmatmul.f32.vlgmr.msra.gmra.mxu1 %v103_v28 }
 0x11d   :  { %v141_v30 = vpop.f32.mrf.mxu1 }
 0x11e   :  { %v142_v31 = vadd.f32 %v181_v29, %v141_v30 }
 0x120   :  { %144 = vmax.xlane.f32.xlu0 %v142_v31 }
 0x193   :  { %v145_v32 = vpop.xlane.xlu0 %144 }
 0x194   :  { %v146_v33 = vsub.f32 %v142_v31, %v145_v32 }
 0x196   :  { %v147_v34 = vmul.f32 1.442695, %v146_v33 }
 0x198   :  { %182 = vpow2.f32 %v147_v34 }
 0x19e   :  { %v183_v35 = vpop.eup %182 }
 0x19f   :  { %149 = vadd.xlane.f32.xlu0 %v183_v35 }
 0x212   :  { %v150_v36 = vpop.xlane.xlu0 %149 }
 0x213   :  { %184 = vlog2.f32 %v150_v36 }
 0x219   :  { %v185_v37 = vpop.eup %184 }
 0x21a   :  { %v152_v38 = vmul.f32 0.6931472, %v185_v37 }
 0x21c   :  { %v153_v39 = vsub.f32 %v146_v33, %v152_v38 }
 0x21e   :  { %154 = vst [vmem:[#allocation8] sm:$0xff] %v153_v39 }
 0x21f   :  { %165 = dma.vmem_to_hbm [thread:$0]  %s161_s11, 128, %s163_s14, [#allocation4]  }
 0x220   :  { %286 = dma.done.wait [#allocation4], 128  }
 0x221   :  { %287 = vsyncadd [#allocation4], 4294967168 }
 0x222   :  { %170 = vsyncpa [#allocation3], 1 }
 0x223   :  { %171 = vsyncpa [#allocation6], 1 }
 0x224   :  { %172 = vsyncpa [#allocation4], 1 }

</bundles_post_ra>
